<compile_context>
chip_gen: v7x
topology: tpu7x:2x2x1
jax: 0.10.0
libtpu: 0.0.40
codegen_flags: <defaults>
</compile_context>

<pallas_src>
import math
import jax
import jax.numpy as jnp
from jax import lax
from jax.experimental import pallas as pl
from jax.experimental.pallas import tpu as pltpu


def _make_mha_kernel(d_k: int, n_inputs: int):
    """Builds the per-(batch, head) kernel.

    n_inputs == 1: self-attention fast path (one activation ref, fused QKV matmul).
    n_inputs == 3: cross-attention path (separate q/k/v activation refs).
    """

    def body(x_refs, wqkv_ref, bqkv_ref, wo_ref, bo_ref, out_ref, acc_ref):
        hh = pl.program_id(1)

        @pl.when(hh == 0)
        def _init():
            acc_ref[...] = jnp.zeros_like(acc_ref)

        w = wqkv_ref[0]            # (D, 3*d_k) bf16, 1/sqrt(d_k) folded into Q cols
        b = bqkv_ref[0]            # (1, 3*d_k) f32

        if n_inputs == 1:
            # Fused QKV projection for this head: one (S,D)@(D,3*d_k) MXU call.
            x = x_refs[0][0]       # (S, D) bf16
            qkv = (jnp.dot(x, w, preferred_element_type=jnp.float32) + b
                   ).astype(jnp.bfloat16)                      # (S, 3*d_k)
            q = qkv[:, :d_k]
            k = qkv[:, d_k:2 * d_k]
            v = qkv[:, 2 * d_k:]
        else:
            def proj(x_ref, lo):
                return (jnp.dot(x_ref[0], w[:, lo:lo + d_k],
                                preferred_element_type=jnp.float32)
                        + b[:, lo:lo + d_k]).astype(jnp.bfloat16)   # (S, d_k)
            q = proj(x_refs[0], 0)
            k = proj(x_refs[1], d_k)
            v = proj(x_refs[2], 2 * d_k)

        # Scores for this head (scale already folded into Wq/bq): (S, S) f32.
        s = lax.dot_general(q, k, (((1,), (1,)), ((), ())),
                            preferred_element_type=jnp.float32)

        # Numerically-stable softmax in f32; 1/denom folded into the context.
        m = jnp.max(s, axis=-1, keepdims=True)
        p = jnp.exp(s - m)
        inv_denom = pl.reciprocal(jnp.sum(p, axis=-1, keepdims=True), approx=True)

        ctx = jnp.dot(p.astype(jnp.bfloat16), v,
                      preferred_element_type=jnp.float32) * inv_denom   # (S, d_k)

        # This head's slice of the output projection, accumulated into (S, D).
        acc_ref[...] += jnp.dot(ctx.astype(jnp.bfloat16), wo_ref[0],
                                preferred_element_type=jnp.float32)

        @pl.when(hh == pl.num_programs(1) - 1)
        def _finalize():
            out_ref[0] = (acc_ref[...] + bo_ref[...]).astype(out_ref.dtype)

    if n_inputs == 1:
        def kernel(x_ref, wqkv_ref, bqkv_ref, wo_ref, bo_ref, out_ref, acc_ref):
            body((x_ref,), wqkv_ref, bqkv_ref, wo_ref, bo_ref, out_ref, acc_ref)
    else:
        def kernel(xq_ref, xk_ref, xv_ref, wqkv_ref, bqkv_ref, wo_ref, bo_ref,
                   out_ref, acc_ref):
            body((xq_ref, xk_ref, xv_ref), wqkv_ref, bqkv_ref, wo_ref, bo_ref,
                 out_ref, acc_ref)
    return kernel


def _prep_params(params, *, h: int, d_k: int, D: int):
    """Host-side, one-time weight re-layout: per-head fused bf16 blocks."""
    scale = 1.0 / math.sqrt(d_k)

    def heads_w(w):   # (D, D) -> (h, D, d_k)
        return w.reshape(D, h, d_k).transpose(1, 0, 2)

    def heads_b(b):   # (1, D) -> (h, 1, d_k)
        return b.reshape(h, d_k)[:, None, :]

    # 1/sqrt(d_k) folded into the Q projection (weight + bias).
    wqkv = jnp.concatenate(
        [heads_w(params["wq"] * scale), heads_w(params["wk"]), heads_w(params["wv"])],
        axis=-1).astype(jnp.bfloat16)                       # (h, D, 3*d_k) bf16
    bqkv = jnp.concatenate(
        [heads_b(params["bq"] * scale), heads_b(params["bk"]), heads_b(params["bv"])],
        axis=-1).astype(jnp.float32)                        # (h, 1, 3*d_k) f32
    wo = params["wo"].reshape(h, d_k, D).astype(jnp.bfloat16)   # (h, d_k, D) bf16
    bo = params["bo"].astype(jnp.float32)                        # (1, D) f32
    return wqkv, bqkv, wo, bo


def _vmem_limit_bytes(*, S: int, D: int, d_k: int, n_x: int) -> int:
    bf16, f32 = 2, 4
    per_step = (
        2 * n_x * S * D * bf16                    # double-buffered activation blocks
        + 2 * (D * 3 * d_k + d_k * D) * bf16      # double-buffered per-head weights
        + 2 * (3 * d_k + D) * f32                 # bias blocks
        + 2 * S * D * f32                         # double-buffered output block
        + S * D * f32                             # f32 accumulator scratch
        + S * 3 * d_k * (f32 + bf16)              # qkv intermediate (+ bf16 copy)
        + 2 * S * S * f32 + S * S * bf16          # scores + probs (+ bf16 copy for PV)
        + S * d_k * (f32 + bf16))                 # per-head context
    est = int(per_step * 1.5)                     # (8,128)-padding / misc headroom

    try:
        info = pltpu.get_tpu_info()
        phys = int(getattr(info, "vmem_capacity_bytes", 0)) or (64 << 20)
    except Exception:
        phys = 64 << 20                           # conservative: v7x per-TC VMEM
    cap = (phys * 3) // 4                         # ~48 MiB on v7x, ~96 MiB on v6e/v5e
    return int(min(cap, max(32 << 20, 2 * est)))


def multi_head_attention(query, key, value, params, *, h: int):
    """query/key/value: [B, S, D] float32; params: dict of f32 weights/biases."""
    B, S, D = query.shape
    assert D % h == 0
    d_k = D // h

    self_attn = (query is key) and (key is value)
    x_inputs = ([query.astype(jnp.bfloat16)] if self_attn
                else [t.astype(jnp.bfloat16) for t in (query, key, value)])
    n_x = len(x_inputs)

    wqkv, bqkv, wo, bo = _prep_params(params, h=h, d_k=d_k, D=D)
    kernel = _make_mha_kernel(d_k, n_inputs=n_x)

    x_spec = pl.BlockSpec((1, S, D), lambda b, hh: (b, 0, 0))
    in_specs = ([x_spec] * n_x + [
        pl.BlockSpec((1, D, 3 * d_k), lambda b, hh: (hh, 0, 0)),   # per-head W_qkv
        pl.BlockSpec((1, 1, 3 * d_k), lambda b, hh: (hh, 0, 0)),   # per-head b_qkv
        pl.BlockSpec((1, d_k, D), lambda b, hh: (hh, 0, 0)),       # per-head W_o rows
        pl.BlockSpec((1, D), lambda b, hh: (0, 0)),                # b_o
    ])

    return pl.pallas_call(
        kernel,
        out_shape=jax.ShapeDtypeStruct((B, S, D), query.dtype),
        grid_spec=pltpu.PrefetchScalarGridSpec(
            num_scalar_prefetch=0,
            grid=(B, h),                      # heads = last (reduction) axis
            in_specs=in_specs,
            out_specs=pl.BlockSpec((1, S, D), lambda b, hh: (b, 0, 0)),
            scratch_shapes=[pltpu.VMEM((S, D), jnp.float32)],
        ),
        compiler_params=pltpu.CompilerParams(
            dimension_semantics=("parallel", "arbitrary"),
            vmem_limit_bytes=_vmem_limit_bytes(S=S, D=D, d_k=d_k, n_x=n_x)),
    )(*x_inputs, wqkv, bqkv, wo, bo)


def _init_params(key, d_model):
    # Deterministic synthetic init (roughly matching nn.Linear's uniform scale).
    ks = jax.random.split(key, 8)
    lim = 1.0 / math.sqrt(d_model)

    def u(k, shape):
        return jax.random.uniform(k, shape, jnp.float32, -lim, lim)

    return {
        "wq": u(ks[0], (d_model, d_model)), "bq": u(ks[1], (1, d_model)),
        "wk": u(ks[2], (d_model, d_model)), "bk": u(ks[3], (1, d_model)),
        "wv": u(ks[4], (d_model, d_model)), "bv": u(ks[5], (1, d_model)),
        "wo": u(ks[6], (d_model, d_model)), "bo": u(ks[7], (1, d_model)),
    }


def _reference(query, key, value, params, *, h):
    """Pure-JAX f32 reference for sanity checking."""
    B, S, D = query.shape
    d_k = D // h

    def lin(x, w, b):
        return x @ w + b

    Q = lin(query, params["wq"], params["bq"]).reshape(B, S, h, d_k).transpose(0, 2, 1, 3)
    K = lin(key,   params["wk"], params["bk"]).reshape(B, S, h, d_k).transpose(0, 2, 1, 3)
    V = lin(value, params["wv"], params["bv"]).reshape(B, S, h, d_k).transpose(0, 2, 1, 3)
    s = jnp.einsum("bhqd,bhkd->bhqk", Q, K) / math.sqrt(d_k)
    p = jax.nn.softmax(s, axis=-1)
    ctx = jnp.einsum("bhqk,bhkd->bhqd", p, V).transpose(0, 2, 1, 3).reshape(B, S, D)
    return lin(ctx, params["wo"], params["bo"])


if __name__ == "__main__":
    B, S, D, H = 2, 8, 32, 4   # batch, seq, d_model, heads  (d_k = 8)
    root = jax.random.PRNGKey(0)
    kq, kk, kv, kp = jax.random.split(root, 4)
    query = jax.random.normal(kq, (B, S, D), jnp.float32)
    key_in = jax.random.normal(kk, (B, S, D), jnp.float32)
    value = jax.random.normal(kv, (B, S, D), jnp.float32)
    params = _init_params(kp, D)

    # Cross-attention path (distinct query/key/value tensors).
    out = jax.block_until_ready(multi_head_attention(query, key_in, value, params, h=H))
    ref = _reference(query, key_in, value, params, h=H)
    assert out.shape == (B, S, D)
    # bf16 storage/matmul operands + approximate reciprocal => bf16-level tolerance.
    assert jnp.allclose(out, ref, atol=2e-2, rtol=2e-2), "mismatch vs reference (cross)"

    # Self-attention fast path (single activation input, fused per-head QKV matmul).
    out_self = jax.block_until_ready(multi_head_attention(query, query, query, params, h=H))
    ref_self = _reference(query, query, query, params, h=H)
    assert jnp.allclose(out_self, ref_self, atol=2e-2, rtol=2e-2), "mismatch vs reference (self)"

    print("KERNEL_OK")
</pallas_src>

<mosaic_0001>
module attributes {stable_mosaic.version = 11 : i64} {
  func.func @kernel(%arg0: i32, %arg1: i32, %arg2: memref<1x8x32xbf16, #tpu.memory_space<vmem>>, %arg3: memref<1x8x32xbf16, #tpu.memory_space<vmem>>, %arg4: memref<1x8x32xbf16, #tpu.memory_space<vmem>>, %arg5: memref<1x32x24xbf16, #tpu.memory_space<vmem>>, %arg6: memref<1x1x24xf32, #tpu.memory_space<vmem>>, %arg7: memref<1x8x32xbf16, #tpu.memory_space<vmem>>, %arg8: memref<1x32xf32, #tpu.memory_space<vmem>>, %arg9: memref<1x8x32xf32, #tpu.memory_space<vmem>>, %arg10: memref<8x32xf32, #tpu.memory_space<vmem>>) attributes {dimension_semantics = [#tpu.dimension_semantics<parallel>, #tpu.dimension_semantics<arbitrary>], iteration_bounds = array<i64: 2, 4>, scalar_prefetch = 0 : i64, scratch_operands = 1 : i64, tpu.core_type = #tpu.core_type<tc>, window_params = [{transform_indices = @transform_0, window_bounds = array<i64: 1, 8, 32>}, {transform_indices = @transform_1, window_bounds = array<i64: 1, 8, 32>}, {transform_indices = @transform_2, window_bounds = array<i64: 1, 8, 32>}, {transform_indices = @transform_3, window_bounds = array<i64: 1, 32, 24>}, {transform_indices = @transform_4, window_bounds = array<i64: 1, 1, 24>}, {transform_indices = @transform_5, window_bounds = array<i64: 1, 8, 32>}, {pipeline_mode = #tpu.pipeline_mode<synchronous>, transform_indices = @transform_6, window_bounds = array<i64: 1, 32>}, {transform_indices = @transform_7, window_bounds = array<i64: 1, 8, 32>}]} {
    %c0_i32 = arith.constant 0 : i32
    %0 = arith.cmpi eq, %arg1, %c0_i32 : i32
    %1 = arith.extui %0 : i1 to i32
    %c0_i32_0 = arith.constant 0 : i32
    %2 = arith.cmpi ne, %1, %c0_i32_0 : i32
    scf.if %2 {
      %cst_30 = arith.constant 0.000000e+00 : f32
      %54 = vector.broadcast %cst_30 : f32 to vector<8x32xf32>
      %c0_31 = arith.constant 0 : index
      %c0_32 = arith.constant 0 : index
      %55 = vector.load %arg10[%c0_31, %c0_32] : memref<8x32xf32, #tpu.memory_space<vmem>>, vector<8x32xf32>
      tpu.vector_store %arg10[%c0_31, %c0_32], %54 {strides = array<i32>} : memref<8x32xf32, #tpu.memory_space<vmem>>, vector<8x32xf32>,
    } else {
    }
    %c0 = arith.constant 0 : index
    %c0_1 = arith.constant 0 : index
    %c0_2 = arith.constant 0 : index
    %3 = vector.load %arg5[%c0, %c0_1, %c0_2] : memref<1x32x24xbf16, #tpu.memory_space<vmem>>, vector<1x32x24xbf16>
    %4 = vector.shape_cast %3 : vector<1x32x24xbf16> to vector<32x24xbf16>
    %c0_3 = arith.constant 0 : index
    %c0_4 = arith.constant 0 : index
    %c0_5 = arith.constant 0 : index
    %5 = vector.load %arg6[%c0_3, %c0_4, %c0_5] : memref<1x1x24xf32, #tpu.memory_space<vmem>>, vector<1x1x24xf32>
    %6 = vector.shape_cast %5 : vector<1x1x24xf32> to vector<1x24xf32>
    %c0_6 = arith.constant 0 : index
    %c0_7 = arith.constant 0 : index
    %c0_8 = arith.constant 0 : index
    %7 = vector.load %arg2[%c0_6, %c0_7, %c0_8] : memref<1x8x32xbf16, #tpu.memory_space<vmem>>, vector<1x8x32xbf16>
    %8 = vector.shape_cast %7 : vector<1x8x32xbf16> to vector<8x32xbf16>
    %9 = vector.extract_strided_slice %4 {offsets = [0, 0], sizes = [32, 8], strides = [1, 1]} : vector<32x24xbf16> to vector<32x8xbf16>
    %cst = arith.constant dense<0.000000e+00> : vector<8x8xf32>
    %10 = tpu.matmul %8, %9, %cst {dimension_numbers = #tpu.dot_dimension_numbers<[1], [0], [0], [1], [0, 0, 1, 1], [], []>} : vector<8x32xbf16>, vector<32x8xbf16>, vector<8x8xf32> -> vector<8x8xf32>
    %11 = vector.extract_strided_slice %6 {offsets = [0, 0], sizes = [1, 8], strides = [1, 1]} : vector<1x24xf32> to vector<1x8xf32>
    %12 = vector.broadcast %11 : vector<1x8xf32> to vector<8x8xf32>
    %13 = arith.addf %10, %12 : vector<8x8xf32>
    %14 = arith.truncf %13 : vector<8x8xf32> to vector<8x8xbf16>
    %c0_9 = arith.constant 0 : index
    %c0_10 = arith.constant 0 : index
    %c0_11 = arith.constant 0 : index
    %15 = vector.load %arg3[%c0_9, %c0_10, %c0_11] : memref<1x8x32xbf16, #tpu.memory_space<vmem>>, vector<1x8x32xbf16>
    %16 = vector.shape_cast %15 : vector<1x8x32xbf16> to vector<8x32xbf16>
    %17 = vector.extract_strided_slice %4 {offsets = [0, 8], sizes = [32, 8], strides = [1, 1]} : vector<32x24xbf16> to vector<32x8xbf16>
    %cst_12 = arith.constant dense<0.000000e+00> : vector<8x8xf32>
    %18 = tpu.matmul %16, %17, %cst_12 {dimension_numbers = #tpu.dot_dimension_numbers<[1], [0], [0], [1], [0, 0, 1, 1], [], []>} : vector<8x32xbf16>, vector<32x8xbf16>, vector<8x8xf32> -> vector<8x8xf32>
    %19 = vector.extract_strided_slice %6 {offsets = [0, 8], sizes = [1, 8], strides = [1, 1]} : vector<1x24xf32> to vector<1x8xf32>
    %20 = vector.broadcast %19 : vector<1x8xf32> to vector<8x8xf32>
    %21 = arith.addf %18, %20 : vector<8x8xf32>
    %22 = arith.truncf %21 : vector<8x8xf32> to vector<8x8xbf16>
    %c0_13 = arith.constant 0 : index
    %c0_14 = arith.constant 0 : index
    %c0_15 = arith.constant 0 : index
    %23 = vector.load %arg4[%c0_13, %c0_14, %c0_15] : memref<1x8x32xbf16, #tpu.memory_space<vmem>>, vector<1x8x32xbf16>
    %24 = vector.shape_cast %23 : vector<1x8x32xbf16> to vector<8x32xbf16>
    %25 = vector.extract_strided_slice %4 {offsets = [0, 16], sizes = [32, 8], strides = [1, 1]} : vector<32x24xbf16> to vector<32x8xbf16>
    %cst_16 = arith.constant dense<0.000000e+00> : vector<8x8xf32>
    %26 = tpu.matmul %24, %25, %cst_16 {dimension_numbers = #tpu.dot_dimension_numbers<[1], [0], [0], [1], [0, 0, 1, 1], [], []>} : vector<8x32xbf16>, vector<32x8xbf16>, vector<8x8xf32> -> vector<8x8xf32>
    %27 = vector.extract_strided_slice %6 {offsets = [0, 16], sizes = [1, 8], strides = [1, 1]} : vector<1x24xf32> to vector<1x8xf32>
    %28 = vector.broadcast %27 : vector<1x8xf32> to vector<8x8xf32>
    %29 = arith.addf %26, %28 : vector<8x8xf32>
    %30 = arith.truncf %29 : vector<8x8xf32> to vector<8x8xbf16>
    %cst_17 = arith.constant dense<0.000000e+00> : vector<8x8xf32>
    %31 = tpu.matmul %14, %22, %cst_17 {dimension_numbers = #tpu.dot_dimension_numbers<[1], [1], [0], [0], [0, 0, 1, 0], [], []>} : vector<8x8xbf16>, vector<8x8xbf16>, vector<8x8xf32> -> vector<8x8xf32>
    %cst_18 = arith.constant dense<0xFF800000> : vector<8xf32>
    %32 = vector.multi_reduction <maximumf>, %31, %cst_18 [1] : vector<8x8xf32> to vector<8xf32>
    %33 = vector.shape_cast %32 : vector<8xf32> to vector<8x1xf32>
    %34 = vector.broadcast %33 : vector<8x1xf32> to vector<8x8xf32>
    %35 = arith.subf %31, %34 : vector<8x8xf32>
    %36 = math.exp %35 : vector<8x8xf32>
    %cst_19 = arith.constant dense<0.000000e+00> : vector<8xf32>
    %37 = vector.multi_reduction <add>, %36, %cst_19 [1] : vector<8x8xf32> to vector<8xf32>
    %38 = vector.shape_cast %37 : vector<8xf32> to vector<8x1xf32>
    %39 = tpu.reciprocal %38 {approx = true} : vector<8x1xf32> -> vector<8x1xf32>
    %40 = arith.truncf %36 : vector<8x8xf32> to vector<8x8xbf16>
    %cst_20 = arith.constant dense<0.000000e+00> : vector<8x8xf32>
    %41 = tpu.matmul %40, %30, %cst_20 {dimension_numbers = #tpu.dot_dimension_numbers<[1], [0], [0], [1], [0, 0, 1, 1], [], []>} : vector<8x8xbf16>, vector<8x8xbf16>, vector<8x8xf32> -> vector<8x8xf32>
    %42 = vector.broadcast %39 : vector<8x1xf32> to vector<8x8xf32>
    %43 = arith.mulf %41, %42 : vector<8x8xf32>
    %c0_21 = arith.constant 0 : index
    %c0_22 = arith.constant 0 : index
    %44 = vector.load %arg10[%c0_21, %c0_22] : memref<8x32xf32, #tpu.memory_space<vmem>>, vector<8x32xf32>
    %45 = arith.truncf %43 : vector<8x8xf32> to vector<8x8xbf16>
    %c0_23 = arith.constant 0 : index
    %c0_24 = arith.constant 0 : index
    %c0_25 = arith.constant 0 : index
    %46 = vector.load %arg7[%c0_23, %c0_24, %c0_25] : memref<1x8x32xbf16, #tpu.memory_space<vmem>>, vector<1x8x32xbf16>
    %47 = vector.shape_cast %46 : vector<1x8x32xbf16> to vector<8x32xbf16>
    %cst_26 = arith.constant dense<0.000000e+00> : vector<8x32xf32>
    %48 = tpu.matmul %45, %47, %cst_26 {dimension_numbers = #tpu.dot_dimension_numbers<[1], [0], [0], [1], [0, 0, 1, 1], [], []>} : vector<8x8xbf16>, vector<8x32xbf16>, vector<8x32xf32> -> vector<8x32xf32>
    %49 = arith.addf %44, %48 : vector<8x32xf32>
    %c0_27 = arith.constant 0 : index
    %c0_28 = arith.constant 0 : index
    %50 = vector.load %arg10[%c0_27, %c0_28] : memref<8x32xf32, #tpu.memory_space<vmem>>, vector<8x32xf32>
    tpu.vector_store %arg10[%c0_27, %c0_28], %49 {strides = array<i32>} : memref<8x32xf32, #tpu.memory_space<vmem>>, vector<8x32xf32>,
    %c3_i32 = arith.constant 3 : i32
    %51 = arith.cmpi eq, %arg1, %c3_i32 : i32
    %52 = arith.extui %51 : i1 to i32
    %c0_i32_29 = arith.constant 0 : i32
    %53 = arith.cmpi ne, %52, %c0_i32_29 : i32
    scf.if %53 {
      %c0_30 = arith.constant 0 : index
      %c0_31 = arith.constant 0 : index
      %54 = vector.load %arg10[%c0_30, %c0_31] : memref<8x32xf32, #tpu.memory_space<vmem>>, vector<8x32xf32>
      %c0_32 = arith.constant 0 : index
      %c0_33 = arith.constant 0 : index
      %55 = vector.load %arg8[%c0_32, %c0_33] : memref<1x32xf32, #tpu.memory_space<vmem>>, vector<1x32xf32>
      %56 = vector.broadcast %55 : vector<1x32xf32> to vector<8x32xf32>
      %57 = arith.addf %54, %56 : vector<8x32xf32>
      %c0_34 = arith.constant 0 : index
      %c0_35 = arith.constant 0 : index
      %c0_36 = arith.constant 0 : index
      %58 = vector.load %arg9[%c0_34, %c0_35, %c0_36] : memref<1x8x32xf32, #tpu.memory_space<vmem>>, vector<1x8x32xf32>
      %59 = vector.shape_cast %58 : vector<1x8x32xf32> to vector<8x32xf32>
      %60 = vector.shape_cast %57 : vector<8x32xf32> to vector<1x8x32xf32>
      tpu.vector_store %arg9[%c0_34, %c0_35, %c0_36], %60 {strides = array<i32>} : memref<1x8x32xf32, #tpu.memory_space<vmem>>, vector<1x8x32xf32>,
    } else {
    }
    return
  }
  func.func @transform_0(%arg0: i32, %arg1: i32) -> (i32, i32, i32) {
    %c0_i32 = arith.constant 0 : i32
    %c0_i32_0 = arith.constant 0 : i32
    %c0_i32_1 = arith.constant 0 : i32
    return %arg0, %c0_i32, %c0_i32_0 : i32, i32, i32
  }
  func.func @transform_1(%arg0: i32, %arg1: i32) -> (i32, i32, i32) {
    %c0_i32 = arith.constant 0 : i32
    %c0_i32_0 = arith.constant 0 : i32
    %c0_i32_1 = arith.constant 0 : i32
    return %arg0, %c0_i32, %c0_i32_0 : i32, i32, i32
  }
  func.func @transform_2(%arg0: i32, %arg1: i32) -> (i32, i32, i32) {
    %c0_i32 = arith.constant 0 : i32
    %c0_i32_0 = arith.constant 0 : i32
    %c0_i32_1 = arith.constant 0 : i32
    return %arg0, %c0_i32, %c0_i32_0 : i32, i32, i32
  }
  func.func @transform_3(%arg0: i32, %arg1: i32) -> (i32, i32, i32) {
    %c0_i32 = arith.constant 0 : i32
    %c0_i32_0 = arith.constant 0 : i32
    %c0_i32_1 = arith.constant 0 : i32
    return %arg1, %c0_i32, %c0_i32_0 : i32, i32, i32
  }
  func.func @transform_4(%arg0: i32, %arg1: i32) -> (i32, i32, i32) {
    %c0_i32 = arith.constant 0 : i32
    %c0_i32_0 = arith.constant 0 : i32
    %c0_i32_1 = arith.constant 0 : i32
    return %arg1, %c0_i32, %c0_i32_0 : i32, i32, i32
  }
  func.func @transform_5(%arg0: i32, %arg1: i32) -> (i32, i32, i32) {
    %c0_i32 = arith.constant 0 : i32
    %c0_i32_0 = arith.constant 0 : i32
    %c0_i32_1 = arith.constant 0 : i32
    return %arg1, %c0_i32, %c0_i32_0 : i32, i32, i32
  }
  func.func @transform_6(%arg0: i32, %arg1: i32) -> (i32, i32) {
    %c0_i32 = arith.constant 0 : i32
    %c0_i32_0 = arith.constant 0 : i32
    %c0_i32_1 = arith.constant 0 : i32
    return %c0_i32, %c0_i32_0 : i32, i32
  }
  func.func @transform_7(%arg0: i32, %arg1: i32) -> (i32, i32, i32) {
    %c0_i32 = arith.constant 0 : i32
    %c0_i32_0 = arith.constant 0 : i32
    %c0_i32_1 = arith.constant 0 : i32
    return %arg0, %c0_i32, %c0_i32_0 : i32, i32, i32
  }
}

</mosaic_0001>

<bundles_post_ra>
// kernel: tpu_custom_call.1
= control target key start
LH: loop header
LB: loop body
LE: loop exit
PB: predicated region body
PF: predicated region fallthrough
CT: control target
= control target key end

     0   :  { %s1376_s0 = inlined_call_operand.vmem [shape: bf16[2,8,32], index: 0, kind: input, shape index: {}]   ;;  %s1377_s1 = inlined_call_operand.vmem [shape: bf16[2,8,32], index: 1, kind: input, shape index: {}]   ;;  %s1378_s2 = inlined_call_operand.vmem [shape: bf16[2,8,32], index: 2, kind: input, shape index: {}]   ;;  %s1379_s3 = inlined_call_operand.vmem [shape: bf16[4,32,24], index: 3, kind: input, shape index: {}]   ;;  %s1380_s4 = inlined_call_operand.vmem [shape: f32[4,1,24], index: 4, kind: input, shape index: {}]   ;;  %s1381_s5 = inlined_call_operand.vmem [shape: bf16[4,8,32], index: 5, kind: input, shape index: {}]   ;;  %s1382_s6 = inlined_call_operand.vmem [shape: f32[1,32], index: 6, kind: input, shape index: {}]   ;;  %s1383_s7 = inlined_call_operand.hbm [shape: f32[2,8,32], index: 7, kind: output, shape index: {}]  }
   0x1   :  { %1394 = sst [smem:[#allocation15_spill]] %s1383_s7 }
   0x2   :  { %12 = vsyncpa [#allocation4], 0 }
   0x3   :  { %14 = vsyncpa [#allocation4 + $0x1], 0  ;;  %s1177_s24 = smov 0   ;;  %s1179_s25 = smov 0  }
   0x4   :  { %s1181_s26 = smov 0   ;;  %s1183_s27 = smov 0  }
   0x5   :  { %s1185_s28 = smov 0   ;;  %s1187_s29 = smov 0  }
   0x6   :  { %s1189_s30 = smov 0   ;;  %s1191_s8 = smov 0  }
   0x7 LB: > { %1395 = sst [smem:[#allocation6_spill]] %s1101_s24  ;;  %s867_s9 = sadd.s32 4294967295, %s1129_s8   ;;  %s1129_s8 = sphi %s1191_s8, %s20_s8   ;;  %s1125_s30 = sphi %s1189_s30, %s1418_s30   ;;  %s1121_s29 = sphi %s1187_s29, %s1417_s29   ;;  %s1117_s28 = sphi %s1185_s28, %s1416_s28   ;;  %s1113_s27 = sphi %s1183_s27, %s1415_s27   ;;  %s1109_s26 = sphi %s1181_s26, %s1414_s26   ;;  %s1105_s25 = sphi %s1179_s25, %s1420_s25   ;;  %s1101_s24 = sphi %s1177_s24, %s1419_s24  }
   0x8   : > { %1396 = sst [smem:[#allocation7_spill]] %s1109_s26  ;;  %s868_s10 = sadd.s32 4294967294, %s1129_s8  }
   0x9   : > { %1397 = sst [smem:[#allocation8_spill]] %s1121_s29  ;;  %s29_s11 = sadd.s32 1, %s1121_s29 }
   0xa   : > { %1398 = sst [smem:[#allocation9_spill]] %s1125_s30  ;;  %p30_p0 = scmp.ge.s32.totalorder %s29_s11, 4 }
   0xb   : > { %1399 = sst [smem:[#allocation10_spill]] %s1129_s8  ;;  %s32_s12 = sadd.s32 1, %s1125_s30 }
   0xc   : > { %p226_p1 = scmp.ne.s32.totalorder %s1109_s26, %s1105_s25  ;;  %p227_p2 = scmp.eq.s32.totalorder %s867_s9, 7 }
   0xd   : > { %s1422_s11 = smov (%p30_p0, %s29_s11), 0  ;;  %s1424_s12 = smov (!%p30_p0, %s32_s12), %s1125_s30 }
   0xe   : > { %1400 = sst [smem:[#allocation11_spill]] %s1422_s11  ;;  %p1226_p3 = por %p227_p2, %p226_p1 }
   0xf   : > { %p232_p4 = scmp.ne.s32.totalorder %s1105_s25, %s1101_s24  ;;  %p34_p5 = scmp.ge.s32.totalorder %s1424_s12, 2 }
  0x10   : > { %p233_p6 = scmp.eq.s32.totalorder %s868_s10, 7  ;;  %p871_p7 = scmp.ge.s32.totalorder %s1129_s8, 1 }
  0x11   : > { %p296_p8 = scmp.lt.s32.totalorder %s1129_s8, 9  ;;  %s1426_s12 = smov (%p34_p5, %s1424_s12), 0 }
  0x12   : > { %1402 = sst [smem:[#allocation12_spill]] %s1426_s12  ;;  %p1236_p9 = por %p233_p6, %p232_p4 }
  0x13   : > { %p297_p10 = pnand %p871_p7, %p296_p8  ;;  %s213_s15 = ssub.s32 %s1125_s30, %s1426_s12 }
  0x14   : > { %s1403_s14 = scalar_select %p1236_p9, 1, 0 }
  0x15   : > { %s216_s16 = sadd.s32 1, %s1109_s26  ;;  %p214_p11 = scmp.eq.s32.totalorder %s213_s15, 0 }
  0x16   : > { %1404 = sst [smem:[#allocation13_spill]] %s1403_s14  ;;  %300 = sbr.rel (%p297_p10) target bundleno = 1225 (0x4c9), region = 48 }
  0x17   : > { %s1244_s17 = scalar_select %p214_p11, %s1109_s26, %s216_s16  }
  0x18   : > { %s1385_s18 = sand.u32 (!%p297_p10), 1, %s1105_s25   ;;  %p347_p12 = scmp.lt.s32.totalorder (!%p297_p10), %s1117_s28, 1 }
  0x19   : > { %1405 = sst [smem:[#allocation14_spill]] %s1244_s17  ;;  %s1250_s19 = sshll.u32 (!%p297_p10), %s1385_s18, 3 }
  0x1a   : > { %p359_p13 = scmp.lt.s32.totalorder (!%p297_p10), %s1113_s27, 3  ;;  %s346_s15 = scalar_lea.vmem (!%p297_p10), [#allocation3], %s1250_s19 }
  0x1b   : > { %p879_p0 = scmp.ne.s32.totalorder (!%p297_p10), %s1113_s27, 0 }
  0x1d   : > { %s348_s20 = scalar_select %p347_p12, %s1117_s28, 1 }
  0x1e   : > { %s360_s21 = scalar_select %p359_p13, %s1113_s27, 3 }
  0x1f   : > { %s1255_s22 = sshll.u32 %s348_s20, 2  ;;  %375 = sbr.rel (%p879_p0) target bundleno = 38 (0x26), region = 52  ;;  %vm376_vm0 = vcmask (!%p879_p0), 261120   ;;  %v1131_v0 = vmov (!%p879_p0), 0.0  }
  0x20   : > { %s354_s12 = scalar_lea.vmem %s1377_s1, %s1255_s22  ;;  %s358_s30 = scalar_lea.vmem %s1378_s2, %s1255_s22  ;;  %377 = vst.msk [vmem:[#allocation2] sm:$0xff] (!%p879_p0), %vm376_vm0, %v1131_v0 }
  0x21   : > { %s895_s29 = sshll.u32 %s360_s21, 4  ;;  %s366_s23 = scalar_lea.vmem %s1380_s4, %s360_s21 }
  0x22   : > { %s363_s20 = scalar_lea.vmem %s1379_s3, %s895_s29  ;;  %s878_s9 = sshll.u32 %s360_s21, 2 }
  0x23   : > { %s1278_s7 = scalar_lea.vmem %s1381_s5, %s878_s9 }
  0x26 PF: > { %v1029_v1 = vld [vmem:[%s363_s20] sm:$0xff]   ;;  %s1132_s26 = smov 120   ;;  %v1030_v2 = vld [vmem:[%s363_s20 + $0x8] sm:$0xff]   ;;  %v1133_v3 = vmov 0.0   ;;  %vm1134_vm1 = vmmov 0   ;;  %s1406_s8 = scalar_lea.vmem %s1376_s0, %s1255_s22  ;;  %vm402_vm2 = vcmask 261120  }
  0x27   : > { %448 = vrot.lane.b32.xlu0 %v1029_v1, %s1132_s26  ;;  %919 = vmatprep.subr.bf16.mxu1 %v1133_v3  ;;  %v880_v4 = vld [vmem:[%s366_s23] ss:$0 sm:$0xff]  ;;  %s1135_s17 = smov 112   ;;  %vm555_vm3 = vcmask 64512   ;;  %vm616_vm4 = vcmask 1043456   ;;  %p889_p1 = scmp.ne.s32.totalorder %s1113_s27, 3 }
  0x28   : > { %911 = vmatprep.subr.bf16.mxu0 %v1133_v3  ;;  %923 = vmatprep.mubr.msk.bf16.mxu1 %vm1134_vm1, %v1133_v3  ;;  %v383_v5 = vld [vmem:[%s1406_s8] sm:$0xf] }
  0x29   : > { %912 = vmatpush3.bf16.msra.mxu0 %v1029_v1  ;;  %915 = vmatprep.mubr.msk.bf16.mxu0 %vm1134_vm1, %v1133_v3  ;;  %v447_v8 = vld [vmem:[%s354_s12] sm:$0xf] }
  0x2a   : > { %913 = vmatprep.subr.bf16.mxu0 %v1133_v3  ;;  %454 = vrot.lane.b32.xlu1 %v880_v4, %s1132_s26  ;;  %v501_v24 = vld [vmem:[%s358_s30] sm:$0xf] }
  0x2b   : > { %450 = vrot.lane.b32.xlu0 %v1030_v2, %s1132_s26  ;;  %v663_v45 = vld [vmem:[%s1278_s7] sm:$0xf] }
  0x2c   : > { %v668_v46 = vsel %vm616_vm4, %v663_v45, 0  ;;  %v661_v55 = vld [vmem:[#allocation2] sm:$0xff] }
  0x2d   : > { %914 = vmatpush3.bf16.msra.mxu0 %v1030_v2  ;;  %v890_v62 = vld [vmem:[%s1382_s6] ss:$0 sm:$0xff] (!%p889_p1) }
  0x2e   : > { %927 = vmatprep.subr.bf16.mxu0 %v1133_v3  ;;  %502 = vrot.lane.b32.xlu1 %v1029_v1, %s1135_s17 }
  0x2f   : > { %504 = vrot.lane.b32.xlu0 %v1030_v2, %s1135_s17 }
  0x30   : > { %916 = vmatmul.mubr.msk.bf16.vlgmr.msra.gmra.mrb[0].mxu0 %vm402_vm2, %v383_v5 }
  0x31   : > { %931 = vmatprep.mubr.msk.bf16.mxu0 %vm1134_vm1, %v1133_v3 }
  0x33   : > { %508 = vrot.lane.b32.xlu0 %v880_v4, %s1135_s17 }
  0x99   : > { %v449_v6 = vpop.permute.xlu0 %448 }
  0x9a   : > { %920 = vmatpush3.bf16.msra.mxu1 %v449_v6 }
  0x9b   : > { %921 = vmatprep.subr.bf16.mxu1 %v1133_v3 }
  0x9c   : > { %v455_v13 = vpop.permute.xlu1 %454 }
  0x9d   : > { %v451_v7 = vpop.permute.xlu0 %450 }
  0x9e   : > { %922 = vmatpush3.bf16.msra.mxu1 %v451_v7 }
  0x9f   : > { %935 = vmatprep.subr.bf16.mxu1 %v1133_v3 }
  0xa0   : > { %v503_v15 = vpop.permute.xlu1 %502 }
  0xa1   : > { %924 = vmatmul.mubr.msk.bf16.vlgmr.msra.gmra.mrb[0].mxu1 %vm402_vm2, %v447_v8  ;;  %928 = vmatpush3.bf16.msra.mxu0 %v503_v15  ;;  %v505_v19 = vpop.permute.xlu0 %504 }
  0xa2   : > { %937 = vmatprep.mubr.msk.bf16.mxu1 %vm1134_vm1, %v1133_v3  ;;  %929 = vmatprep.subr.bf16.mxu0 %v1133_v3 }
  0xa5   : > { %930 = vmatpush3.bf16.msra.mxu0 %v505_v19  ;;  %v509_v32 = vpop.permute.xlu0 %508 }
  0xa6   : > { %941 = vmatprep.subr.bf16.mxu0 %v1133_v3 }
  0xa8   : > { %932 = vmatmul.mubr.msk.bf16.vlgmr.msra.gmra.mrb[4].mxu0 %vm402_vm2, %v501_v24 }
  0xa9   : > { %943 = vmatprep.mubr.msk.bf16.mxu0 %vm1134_vm1, %v1133_v3 }
 0x103   : > { %v440_v9 = vpop.f32.mrb[0].mxu0 }
 0x104   : > { %v917_v10 = vpop.f32.mrb[1].mxu0  ;;  %v441_v23 = vadd.f32 %v880_v4, %v440_v9 }
 0x105   : > { %v443_v11 = vpop.f32.mrb[2].mxu0 }
 0x106   : > { %v918_v12 = vpop.f32.mrb[3].mxu0  ;;  %v446_v25 = vpack.c.bf16 %v441_v23, %v441_v23 }
 0x174   : > { %v494_v14 = vpop.f32.mrb[0].mxu1 }
 0x175   : > { %v495_v16 = vadd.f32 %v494_v14, %v455_v13  ;;  %v925_v17 = vpop.f32.mrb[1].mxu1 }
 0x176   : > { %v497_v18 = vpop.f32.mrb[2].mxu1 }
 0x177   : > { %v500_v20 = vpack.c.bf16 %v495_v16, %v495_v16  ;;  %v926_v21 = vpop.f32.mrb[3].mxu1 }
 0x179   : > { %v560_v22 = vsel %vm555_vm3, %v500_v20, 0 }
 0x17a   : > { %936 = vmatpush3.bf16.xpose.msra.mxu1 %v560_v22 }
 0x17b   : > { %947 = vmatprep.subr.bf16.mxu1 %v1133_v3  ;;  %v548_v31 = vpop.f32.mrb[4].mxu0 }
 0x17c   : > { %v933_v33 = vpop.f32.mrb[5].mxu0  ;;  %v549_v34 = vadd.f32 %v548_v31, %v509_v32 }
 0x17d   : > { %v551_v35 = vpop.f32.mrb[6].mxu0 }
 0x17e   : > { %v554_v36 = vpack.c.bf16 %v549_v34, %v549_v34  ;;  %v934_v37 = vpop.f32.mrb[7].mxu0 }
 0x180   : > { %v618_v38 = vsel %vm616_vm4, %v554_v36, 0 }
 0x181   : > { %938 = vmatmul.mubr.msk.bf16.vlgmr.msra.gmra.mrb[4].mxu1 %vm555_vm3, %v446_v25  ;;  %942 = vmatpush3.bf16.msra.mxu0 %v618_v38 }
 0x182   : > { %949 = vmatprep.mubr.msk.bf16.mxu1 %vm1134_vm1, %v1133_v3  ;;  %948 = vmatpush3.bf16.msra.mxu1 %v668_v46 }
 0x254   : > { %v596_v26 = vpop.f32.mrb[4].mxu1 }
 0x255   : > { %v939_v27 = vpop.f32.mrb[5].mxu1  ;;  %v602_v28 = vsel %vm555_vm3, %v596_v26, -inf }
 0x256   : > { %603 = vmax.xlane.f32.xlu1 %v602_v28  ;;  %v599_v29 = vpop.f32.mrb[6].mxu1 }
 0x257   : > { %v940_v30 = vpop.f32.mrb[7].mxu1 }
 0x2e3   : > { %v604_v39 = vpop.xlane.xlu1 %603 }
 0x2e4   : > { %v605_v40 = vsub.f32 %v596_v26, %v604_v39 }
 0x2e6   : > { %v606_v41 = vmul.f32 1.442695, %v605_v40 }
 0x2e8   : > { %1031 = vpow2.f32 %v606_v41 }
 0x2f2   : > { %v1032_v42 = vpop.eup %1031 }
 0x2f3   : > { %v608_v43 = vsel %vm555_vm3, %v1032_v42, 0.0  ;;  %v612_v44 = vpack.c.bf16 %v1032_v42, %v1032_v42 }
 0x2f4   : > { %609 = vadd.xlane.f32.xlu0 %v608_v43 }
 0x2f5   : > { %944 = vmatmul.mubr.msk.bf16.vlgmr.msra.gmra.mrb[8].mxu0 %vm555_vm3, %v612_v44 }
 0x381   : > { %v610_v47 = vpop.xlane.xlu0 %609 }
 0x382   : > { %1033 = vrcp.f32 %v610_v47 }
 0x38c   : > { %v1034_v48 = vpop.eup %1033 }
 0x3c8   : > { %v654_v49 = vpop.f32.mrb[8].mxu0 }
 0x3c9   : > { %v660_v50 = vmul.f32 %v1034_v48, %v654_v49  ;;  %v945_v51 = vpop.f32.mrb[9].mxu0 }
 0x3ca   : > { %v657_v52 = vpop.f32.mrb[10].mxu0 }
 0x3cb   : > { %v662_v53 = vpack.c.bf16 %v660_v50, %v660_v50  ;;  %v946_v54 = vpop.f32.mrb[11].mxu0 }
 0x3cd   : > { %950 = vmatmul.mubr.msk.bf16.vlgmr.msra.gmra.mrb[8].mxu1 %vm555_vm3, %v662_v53 }
 0x49d   : > { %715 = sbr.rel (%p889_p1) target bundleno = 1198 (0x4ae), region = 56 }
 0x4a0   : > { %v704_v56 = vpop.f32.mrb[8].mxu1 }
 0x4a1   : > { %v710_v57 = vadd.f32 %v704_v56, %v661_v55  ;;  %v951_v58 = vpop.f32.mrb[9].mxu1 }
 0x4a2   : > { %v707_v59 = vpop.f32.mrb[10].mxu1 }
 0x4a3   : > { %711 = vst.msk [vmem:[#allocation2] sm:$0xff] %vm402_vm2, %v710_v57  ;;  %v952_v60 = vpop.f32.mrb[11].mxu1 }
 0x4aa   : > { %v716_v61 = vld [vmem:[#allocation2] sm:$0xff] }
 0x4ab   : > { %v724_v63 = vadd.f32 %v890_v62, %v716_v61 }
 0x4ad   : > { %725 = vst.msk [vmem:[%s346_s15] sm:$0xff] %vm402_vm2, %v724_v63 }
 0x4ae PF: > { %s892_s21 = sshll.u32 %s1117_s28, 7  ;;  %s1407_s27 = sld [smem:[#allocation15_spill]] }
 0x4af   : > { %s740_s23 = sshll.u32 %s346_s15, 4  ;;  %s1409_s9 = sand.u32 1, %s1105_s25   ;;  %s741_s23 = int_to_ptr.vmem [resolvable:$true] %s740_s23 }
 0x4b0   : > { %s727_s26 = scalar_lea.sflag [#allocation4], %s1409_s9  ;;  %s1035_s24 = scalar_lea.vmem %s741_s23, 128 }
 0x4b1   : > { %p1036_p2 = scmp.ne.s32.totalorder %s741_s23, %s1035_s24  ;;  %s1136_s29 = smov [#allocation3]  }
 0x4b2   : > { %s1039_s8 = sshll.u32 %s1136_s29, 4  ;;  %s1040_s8 = int_to_ptr.vmem [resolvable:$false] %s1039_s8 }
 0x4b3   : > { %p1037_p4 = pnand %p1036_p2, %p1226_p3  ;;  %s1041_s11 = scalar_lea.vmem %s1040_s8, 256 }
 0x4b4   : > { %s1408_s16 = smov %s1407_s27  ;;  %s1325_s20 = scalar_lea.hbm %s1407_s27, %s892_s21 }
 0x4b5   : > { %p1038_p5 = pneg %p1037_p4  ;;  %p1042_p6 = scmp.lt.s32.totalorder %s741_s23, %s1040_s8 }
 0x4b6   : > { %p1043_p7 = scmp.lt.s32.totalorder %s1041_s11, %s1035_s24 }
 0x4b8   : > { %p1044_p8 = por %p1043_p7, %p1042_p6 }
 0x4ba   : > { %p1045_p10 = pnand %p1044_p8, %p1038_p5 }
 0x4bc   : > { %1048 = shalt.err (!%p1045_p10)
}
 0x4bd   : > { %s1049_s28 = scalar_lea.hbm %s1325_s20, 128  ;;  %s1053_s14 = scalar_lea.hbm %s1408_s16, 256 }
 0x4be   : > { %p1050_p11 = scmp.ne.s32.totalorder %s1325_s20, %s1049_s28  ;;  %p1054_p0 = scmp.lt.u32.totalorder %s1325_s20, %s1408_s16 }
 0x4bf   : > { %p1055_p1 = scmp.lt.u32.totalorder %s1053_s14, %s1049_s28  ;;  %p1057_p4 = scmp.lt.u32.totalorder %s1049_s28, %s1325_s20 }
 0x4c0   : > { %p1051_p12 = pnand %p1050_p11, %p1226_p3 }
 0x4c1   : > { %p1056_p2 = por %p1055_p1, %p1054_p0 }
 0x4c2   : > { %p1052_p13 = pneg %p1051_p12 }
 0x4c3   : > { %p1058_p5 = por %p1057_p4, %p1056_p2 }
 0x4c5   : > { %p1059_p6 = pnand %p1058_p5, %p1052_p13 }
 0x4c7   : > { %1062 = shalt.err (!%p1059_p6)
}
 0x4c8   : > { %953 = dma.vmem_to_hbm [thread:$0]  (%p1226_p3), %s741_s23, 128, %s1325_s20, %s727_s26  }
 0x4c9 PF: > { %s1410_s18 = sld [smem:[#allocation10_spill]]  ;;  %s1411_s7 = sld [smem:[#allocation6_spill]] }
 0x4cf   : > { %p959_p7 = scmp.ge.s32.totalorder %s1410_s18, 2  ;;  %s752_s21 = sand.u32 1, %s1411_s7  }
 0x4d0   : > { %s753_s22 = scalar_lea.sflag [#allocation4], %s752_s21 }
 0x4d1   : > { %p956_p8 = pnand %p959_p7, %p1236_p9 }
 0x4d3   : > { %1096 = dma.done.wait (!%p956_p8), %s753_s22, 128  }
 0x4d4   : > { %1098 = vsyncadd (!%p956_p8), %s753_s22, 4294967168  ;;  %s20_s8 = sadd.s32 1, %s1410_s18   ;;  %s1413_s10 = sld [smem:[#allocation7_spill]] }
 0x4d5   : > { %p17_p10 = scmp.ge.s32.totalorder %s20_s8, 10   ;;  %s1414_s26 = sld [smem:[#allocation14_spill]] }
 0x4d6   : > { %s1415_s27 = sld [smem:[#allocation8_spill]]  ;;  %s1416_s28 = sld [smem:[#allocation9_spill]] }
 0x4d7   : > { %s1417_s29 = sld [smem:[#allocation11_spill]]  ;;  %s1418_s30 = sld [smem:[#allocation12_spill]] }
 0x4d8   : > { %s1419_s24 = smov %s1105_s25  ;;  %19 = sbr.rel (!%p17_p10) target bundleno = 7 (0x7), region = 106 }
 0x4da   : > { %s1420_s25 = smov %s1413_s10 }
 0x4df   :  { %758 = vsyncpa [#allocation4], 1 }
 0x4e0   :  { %760 = vsyncpa [#allocation4 + $0x1], 1 }

</bundles_post_ra>
